<compile_context>
chip_gen: v7x
topology: tpu7x:2x2x1
jax: 0.10.0
libtpu: 0.0.40
codegen_flags: <defaults>
</compile_context>

<pallas_src>
import functools

import jax
import jax.numpy as jnp
from jax.experimental import pallas as pl
from jax.experimental.pallas import tpu as pltpu

_LANE = 128
_SUBLANE = 8
_MIB = 1 << 20


def _round_up(n, m):
    return ((n + m - 1) // m) * m


def _vmem_capacity_bytes():
    # Physical per-TensorCore VMEM: v5e/v6e 128 MiB, v7x 64 MiB.
    try:
        cap = getattr(pltpu.get_tpu_info(), "vmem_capacity_bytes", None)
        if cap:
            return int(cap)
    except Exception:
        pass
    return 64 * _MIB  # conservative fallback, safe on every generation


def _choose_batch_block(B, per_sample_bytes, budget):
    # Largest divisor Bt of B whose block fits the budget while keeping at least
    # min(B, 4) grid steps, so the input/output DMAs pipeline and both v7x
    # TensorCores receive work.
    target_steps = min(B, 4)
    best = 1
    for bt in range(1, B + 1):
        if B % bt:
            continue
        if bt * per_sample_bytes > budget:
            break
        if B // bt >= target_steps:
            best = bt
    return best


def _choose_hw_tile(C, hw, itemsize, tile_budget):
    lanes = (tile_budget // max(1, _round_up(C, _SUBLANE) * itemsize)) // _LANE * _LANE
    lanes = max(_LANE, lanes)
    return int(min(_round_up(hw, _LANE), lanes))


# ---------------------------------------------------------------------------
# Fused single-pass kernel: pool + FC + sigmoid + apply on one resident block.
# ---------------------------------------------------------------------------
def _fused_kernel(x_ref, w1t_ref, w2t_ref, o_ref, *, inv_hw):
    # x_ref/o_ref: (Bt, C, HW)   w1t: (C, Cr)   w2t: (Cr, C)
    bt = x_ref.shape[0]
    x = x_ref[...]

    # Pooling with f32 accumulation; block is unpadded so no masking is needed.
    avg = jnp.sum(x, axis=-1, dtype=jnp.float32) * inv_hw             # (Bt, C)
    mx = jnp.max(x, axis=-1).astype(jnp.float32)                      # (Bt, C)

    # One shared FC traversal for both pooled vectors of every sample in the block.
    pooled = jnp.concatenate([avg, mx], axis=0)                       # (2Bt, C)
    h = jnp.dot(pooled, w1t_ref[...], preferred_element_type=jnp.float32)
    h = jnp.maximum(h, 0.0)                                           # (2Bt, Cr)
    z = jnp.dot(h, w2t_ref[...], preferred_element_type=jnp.float32)  # (2Bt, C)
    y = jax.nn.sigmoid(z[:bt] + z[bt:])                               # (Bt, C)

    # Gate applied in the input dtype (matches running the module in that dtype;
    # for bf16 inputs the gate is quantized to bf16 before the scale).
    o_ref[...] = x * y[:, :, None].astype(o_ref.dtype)


# ---------------------------------------------------------------------------
# Two-pass path: pass 1 = tiled spatial reduction + tiny FC, pass 2 = apply gate.
# ---------------------------------------------------------------------------
def _reduce_fc_kernel(x_ref, w1_ref, w2_ref, y_ref, sum_acc, max_acc, *, hw):
    # x_ref: (1, C, Thw)   w1: (Cr, C)   w2: (C, Cr)   y_ref: (1, C, 1) f32
    # sum_acc/max_acc: (C, 1) f32 running spatial reductions for the current b.
    t = pl.program_id(1)
    n_t = pl.num_programs(1)
    t_hw = x_ref.shape[-1]
    full_t = hw // t_hw        # tiles with every lane valid            (static)
    rem = hw % t_hw            # valid lanes in the ragged tail tile    (static)

    @pl.when(t == 0)
    def _():
        sum_acc[...] = jnp.zeros_like(sum_acc)
        max_acc[...] = jnp.full_like(max_acc, -jnp.inf)

    def _accumulate(x_sum, x_max):
        sum_acc[...] += jnp.sum(x_sum, axis=-1, keepdims=True, dtype=jnp.float32)
        max_acc[...] = jnp.maximum(
            max_acc[...],
            jnp.max(x_max, axis=-1, keepdims=True).astype(jnp.float32))

    if rem == 0:
        _accumulate(x_ref[0], x_ref[0])
    else:
        @pl.when(t < full_t)
        def _():
            x = x_ref[0]
            _accumulate(x, x)

        @pl.when(t == full_t)   # the single ragged tail tile: mask invalid lanes
        def _():
            x = x_ref[0]
            lane = jax.lax.broadcasted_iota(jnp.int32, (1, t_hw), 1)
            valid = lane < rem
            _accumulate(jnp.where(valid, x, jnp.zeros_like(x)),
                        jnp.where(valid, x, jnp.full_like(x, -jnp.inf)))

    @pl.when(t == n_t - 1)
    def _():
        # Tiny per-sample FC; avg/max stacked so the weights are traversed once.
        avg = sum_acc[...] * (1.0 / hw)                                # (C, 1)
        pooled = jnp.concatenate([avg, max_acc[...]], axis=1)          # (C, 2)
        h = jnp.dot(w1_ref[...], pooled, preferred_element_type=jnp.float32)
        h = jnp.maximum(h, 0.0)                                        # (Cr, 2)
        z = jnp.dot(w2_ref[...], h, preferred_element_type=jnp.float32)   # (C, 2)
        y_ref[0] = jax.nn.sigmoid(z[:, 0:1] + z[:, 1:2])               # (C, 1)


def _apply_kernel(x_ref, y_ref, o_ref):
    # x_ref/o_ref: (1, C, Thw)   y_ref: (1, C, 1) f32
    o_ref[0] = x_ref[0] * y_ref[0].astype(o_ref.dtype)


# ---------------------------------------------------------------------------
# Wrapper
# ---------------------------------------------------------------------------
def channel_attention(x, w1, w2, *, hw_tile=None, force_two_pass=False):
    """x: (B, C, H, W); w1: (C//r, C); w2: (C, C//r). Returns (B, C, H, W)."""
    B, C, H, W = x.shape
    Cr = w1.shape[0]
    HW = H * W
    itemsize = jnp.dtype(x.dtype).itemsize
    x_flat = x.reshape(B, C, HW)                    # metadata-only reshape

    vmem_budget = (_vmem_capacity_bytes() * 3) // 4     # ~48 MiB v7x, ~96 MiB v5e/v6e
    max_fused_block_bytes = vmem_budget // 5            # 2x in + 2x out buffers + slack

    # VMEM footprint of one sample's (C, HW) slab, including internal tile padding.
    per_sample_bytes = _round_up(C, _SUBLANE) * _round_up(HW, _LANE) * itemsize
    use_fused = (not force_two_pass) and per_sample_bytes <= max_fused_block_bytes

    w_bytes = (w1.size + w2.size) * jnp.dtype(w1.dtype).itemsize

    if use_fused:
        bt = _choose_batch_block(B, per_sample_bytes, max_fused_block_bytes)
        block_bytes = bt * per_sample_bytes
        w1t = jnp.transpose(w1)   # (C, Cr) — one-time wrapper op
        w2t = jnp.transpose(w2)   # (Cr, C)
        out = pl.pallas_call(
            functools.partial(_fused_kernel, inv_hw=1.0 / HW),
            out_shape=jax.ShapeDtypeStruct((B, C, HW), x.dtype),
            grid_spec=pltpu.PrefetchScalarGridSpec(
                num_scalar_prefetch=0,
                grid=(B // bt,),
                in_specs=[
                    pl.BlockSpec((bt, C, HW), lambda b: (b, 0, 0)),
                    pl.BlockSpec((C, Cr), lambda b: (0, 0)),
                    pl.BlockSpec((Cr, C), lambda b: (0, 0)),
                ],
                out_specs=pl.BlockSpec((bt, C, HW), lambda b: (b, 0, 0)),
            ),
            compiler_params=pltpu.CompilerParams(
                dimension_semantics=("parallel",),
                vmem_limit_bytes=int(
                    min(vmem_budget, max(32 * _MIB, 4 * block_bytes + 8 * _MIB))),
            ),
            cost_estimate=pl.CostEstimate(
                flops=int(3 * B * C * HW + 8 * B * C * Cr),
                transcendentals=int(B * C),
                bytes_accessed=int(2 * B * C * HW * itemsize + w_bytes),
            ),
        )(x_flat, w1t, w2t)
    else:
        tile_budget = min(8 * _MIB, vmem_budget // 6)
        t_hw = hw_tile if hw_tile is not None else _choose_hw_tile(
            C, HW, itemsize, tile_budget)
        t_hw = max(_LANE, _round_up(min(t_hw, _round_up(HW, _LANE)), _LANE))
        n_t = pl.cdiv(HW, t_hw)                      # ragged tail handled in-kernel
        tile_bytes = _round_up(C, _SUBLANE) * t_hw * itemsize

        # Pass 1: tiled spatial reduction -> per-(b,c) gate y = sigmoid(fc(avg)+fc(max)).
        y = pl.pallas_call(
            functools.partial(_reduce_fc_kernel, hw=HW),
            out_shape=jax.ShapeDtypeStruct((B, C, 1), jnp.float32),
            grid_spec=pltpu.PrefetchScalarGridSpec(
                num_scalar_prefetch=0,
                grid=(B, n_t),
                in_specs=[
                    pl.BlockSpec((1, C, t_hw), lambda b, t: (b, 0, t)),
                    pl.BlockSpec((Cr, C), lambda b, t: (0, 0)),
                    pl.BlockSpec((C, Cr), lambda b, t: (0, 0)),
                ],
                out_specs=pl.BlockSpec((1, C, 1), lambda b, t: (b, 0, 0)),
                scratch_shapes=[
                    pltpu.VMEM((C, 1), jnp.float32),   # running sum
                    pltpu.VMEM((C, 1), jnp.float32),   # running max
                ],
            ),
            compiler_params=pltpu.CompilerParams(
                dimension_semantics=("parallel", "arbitrary"),
                vmem_limit_bytes=int(
                    min(vmem_budget, max(32 * _MIB, 3 * tile_bytes + 4 * _MIB))),
            ),
            cost_estimate=pl.CostEstimate(
                flops=int(2 * B * C * HW + 8 * B * C * Cr),
                transcendentals=int(B * C),
                bytes_accessed=int(B * C * HW * itemsize + w_bytes + B * C * 4),
            ),
        )(x_flat, w1, w2)

        # Pass 2: re-read x in HW tiles and apply the gate (lane-dense stores).
        out = pl.pallas_call(
            _apply_kernel,
            out_shape=jax.ShapeDtypeStruct((B, C, HW), x.dtype),
            grid_spec=pltpu.PrefetchScalarGridSpec(
                num_scalar_prefetch=0,
                grid=(B, n_t),
                in_specs=[
                    pl.BlockSpec((1, C, t_hw), lambda b, t: (b, 0, t)),
                    pl.BlockSpec((1, C, 1), lambda b, t: (b, 0, 0)),
                ],
                out_specs=pl.BlockSpec((1, C, t_hw), lambda b, t: (b, 0, t)),
            ),
            compiler_params=pltpu.CompilerParams(
                dimension_semantics=("parallel", "parallel"),
                vmem_limit_bytes=int(
                    min(vmem_budget, max(32 * _MIB, 4 * tile_bytes + 4 * _MIB))),
            ),
            cost_estimate=pl.CostEstimate(
                flops=int(B * C * HW),
                transcendentals=0,
                bytes_accessed=int(2 * B * C * HW * itemsize + B * C * 4),
            ),
        )(x_flat, y)

    return out.reshape(B, C, H, W)


def reference_channel_attention(x, w1, w2):
    # Pure-JAX reference mirroring the PyTorch forward.
    xf = x.astype(jnp.float32)
    avg = jnp.mean(xf, axis=(2, 3))                       # (B, C)
    mx = jnp.max(xf, axis=(2, 3))                         # (B, C)

    def fc(v):
        h = jnp.maximum(v @ w1.astype(jnp.float32).T, 0.0)
        return h @ w2.astype(jnp.float32).T

    y = jax.nn.sigmoid(fc(avg) + fc(mx))                  # (B, C)
    return (xf * y[:, :, None, None]).astype(x.dtype)


if __name__ == "__main__":
    key = jax.random.PRNGKey(0)
    kx, k1, k2, kx2 = jax.random.split(key, 4)

    B, C, H, W, r = 2, 4, 16, 16, 2
    Cr = C // r

    x = jax.random.normal(kx, (B, C, H, W), dtype=jnp.float32)
    w1 = jax.random.normal(k1, (Cr, C), dtype=jnp.float32) * 0.1   # Conv2d(C, C//r, 1)
    w2 = jax.random.normal(k2, (C, Cr), dtype=jnp.float32) * 0.1   # Conv2d(C//r, C, 1)

    ref = reference_channel_attention(x, w1, w2)

    # 1) Fused single-pass path.
    out = jax.block_until_ready(channel_attention(x, w1, w2))
    assert out.shape == (B, C, H, W)
    assert bool(jnp.allclose(out, ref, atol=1e-5, rtol=1e-5)), "fused path mismatch"

    # 2) Two-pass (tiled-HW) path on the same inputs (HW divisible by the tile).
    out2 = jax.block_until_ready(
        channel_attention(x, w1, w2, force_two_pass=True, hw_tile=128))
    assert bool(jnp.allclose(out2, ref, atol=1e-5, rtol=1e-5)), "two-pass mismatch"

    # 3) Non-128-multiple spatial size with mostly-negative values
    #    (exercises the unpadded fused block and the ragged-tail masking), both paths.
    H3 = W3 = 13
    x3 = jax.random.normal(kx2, (B, C, H3, W3), dtype=jnp.float32) - 5.0
    ref3 = reference_channel_attention(x3, w1, w2)
    out3 = jax.block_until_ready(channel_attention(x3, w1, w2))
    assert bool(jnp.allclose(out3, ref3, atol=1e-5, rtol=1e-5)), "fused ragged mismatch"
    out4 = jax.block_until_ready(
        channel_attention(x3, w1, w2, force_two_pass=True, hw_tile=128))
    assert bool(jnp.allclose(out4, ref3, atol=1e-5, rtol=1e-5)), "two-pass ragged mismatch"

    print("KERNEL_OK")
</pallas_src>

<mosaic_0001>
module attributes {stable_mosaic.version = 11 : i64} {
  func.func @_fused_kernel(%arg0: i32, %arg1: memref<1x4x256xf32, #tpu.memory_space<vmem>>, %arg2: memref<4x2xf32, #tpu.memory_space<vmem>>, %arg3: memref<2x4xf32, #tpu.memory_space<vmem>>, %arg4: memref<1x4x256xf32, #tpu.memory_space<vmem>>) attributes {dimension_semantics = [#tpu.dimension_semantics<parallel>], iteration_bounds = array<i64: 2>, scalar_prefetch = 0 : i64, scratch_operands = 0 : i64, tpu.core_type = #tpu.core_type<tc>, window_params = [{transform_indices = @transform_0, window_bounds = array<i64: 1, 4, 256>}, {pipeline_mode = #tpu.pipeline_mode<synchronous>, transform_indices = @transform_1, window_bounds = array<i64: 4, 2>}, {pipeline_mode = #tpu.pipeline_mode<synchronous>, transform_indices = @transform_2, window_bounds = array<i64: 2, 4>}, {transform_indices = @transform_3, window_bounds = array<i64: 1, 4, 256>}]} {
    %c0 = arith.constant 0 : index
    %c0_0 = arith.constant 0 : index
    %c0_1 = arith.constant 0 : index
    %0 = vector.load %arg1[%c0, %c0_0, %c0_1] : memref<1x4x256xf32, #tpu.memory_space<vmem>>, vector<1x4x256xf32>
    %cst = arith.constant dense<0.000000e+00> : vector<1x4xf32>
    %1 = vector.multi_reduction <add>, %0, %cst [2] : vector<1x4x256xf32> to vector<1x4xf32>
    %cst_2 = arith.constant 3.906250e-03 : f32
    %2 = vector.broadcast %cst_2 : f32 to vector<1x4xf32>
    %3 = arith.mulf %1, %2 : vector<1x4xf32>
    %cst_3 = arith.constant dense<0xFF800000> : vector<1x4xf32>
    %4 = vector.multi_reduction <maximumf>, %0, %cst_3 [2] : vector<1x4x256xf32> to vector<1x4xf32>
    %5 = tpu.concatenate %3, %4 in 0 : vector<1x4xf32>, vector<1x4xf32> -> vector<2x4xf32>
    %c0_4 = arith.constant 0 : index
    %c0_5 = arith.constant 0 : index
    %6 = vector.load %arg2[%c0_4, %c0_5] : memref<4x2xf32, #tpu.memory_space<vmem>>, vector<4x2xf32>
    %cst_6 = arith.constant dense<0.000000e+00> : vector<2x2xf32>
    %7 = tpu.matmul %5, %6, %cst_6 {dimension_numbers = #tpu.dot_dimension_numbers<[1], [0], [0], [1], [0, 0, 1, 1], [], []>} : vector<2x4xf32>, vector<4x2xf32>, vector<2x2xf32> -> vector<2x2xf32>
    %cst_7 = arith.constant 0.000000e+00 : f32
    %8 = vector.broadcast %cst_7 : f32 to vector<2x2xf32>
    %9 = arith.maximumf %7, %8 : vector<2x2xf32>
    %c0_8 = arith.constant 0 : index
    %c0_9 = arith.constant 0 : index
    %10 = vector.load %arg3[%c0_8, %c0_9] : memref<2x4xf32, #tpu.memory_space<vmem>>, vector<2x4xf32>
    %cst_10 = arith.constant dense<0.000000e+00> : vector<2x4xf32>
    %11 = tpu.matmul %9, %10, %cst_10 {dimension_numbers = #tpu.dot_dimension_numbers<[1], [0], [0], [1], [0, 0, 1, 1], [], []>} : vector<2x2xf32>, vector<2x4xf32>, vector<2x4xf32> -> vector<2x4xf32>
    %12 = vector.extract_strided_slice %11 {offsets = [0, 0], sizes = [1, 4], strides = [1, 1]} : vector<2x4xf32> to vector<1x4xf32>
    %13 = vector.extract_strided_slice %11 {offsets = [1, 0], sizes = [1, 4], strides = [1, 1]} : vector<2x4xf32> to vector<1x4xf32>
    %14 = arith.addf %12, %13 : vector<1x4xf32>
    %15 = arith.negf %14 : vector<1x4xf32>
    %16 = math.exp %15 : vector<1x4xf32>
    %cst_11 = arith.constant 1.000000e+00 : f32
    %17 = vector.broadcast %cst_11 : f32 to vector<1x4xf32>
    %18 = arith.addf %17, %16 : vector<1x4xf32>
    %19 = arith.divf %17, %18 : vector<1x4xf32>
    %20 = vector.shape_cast %19 : vector<1x4xf32> to vector<1x4x1xf32>
    %21 = vector.broadcast %20 : vector<1x4x1xf32> to vector<1x4x256xf32>
    %22 = arith.mulf %0, %21 : vector<1x4x256xf32>
    %c0_12 = arith.constant 0 : index
    %c0_13 = arith.constant 0 : index
    %c0_14 = arith.constant 0 : index
    %23 = vector.load %arg4[%c0_12, %c0_13, %c0_14] : memref<1x4x256xf32, #tpu.memory_space<vmem>>, vector<1x4x256xf32>
    tpu.vector_store %arg4[%c0_12, %c0_13, %c0_14], %22 {strides = array<i32>} : memref<1x4x256xf32, #tpu.memory_space<vmem>>, vector<1x4x256xf32>,
    return
  }
  func.func @transform_0(%arg0: i32) -> (i32, i32, i32) {
    %c0_i32 = arith.constant 0 : i32
    %c0_i32_0 = arith.constant 0 : i32
    %c0_i32_1 = arith.constant 0 : i32
    return %arg0, %c0_i32, %c0_i32_0 : i32, i32, i32
  }
  func.func @transform_1(%arg0: i32) -> (i32, i32) {
    %c0_i32 = arith.constant 0 : i32
    %c0_i32_0 = arith.constant 0 : i32
    %c0_i32_1 = arith.constant 0 : i32
    return %c0_i32, %c0_i32_0 : i32, i32
  }
  func.func @transform_2(%arg0: i32) -> (i32, i32) {
    %c0_i32 = arith.constant 0 : i32
    %c0_i32_0 = arith.constant 0 : i32
    %c0_i32_1 = arith.constant 0 : i32
    return %c0_i32, %c0_i32_0 : i32, i32
  }
  func.func @transform_3(%arg0: i32) -> (i32, i32, i32) {
    %c0_i32 = arith.constant 0 : i32
    %c0_i32_0 = arith.constant 0 : i32
    %c0_i32_1 = arith.constant 0 : i32
    return %arg0, %c0_i32, %c0_i32_0 : i32, i32, i32
  }
}

</mosaic_0001>

<bundles_post_ra>
// kernel: tpu_custom_call.1
= control target key start
LH: loop header
LB: loop body
LE: loop exit
PB: predicated region body
PF: predicated region fallthrough
CT: control target
= control target key end

     0   :  { %8 = vsyncpa [#allocation3], 0  ;;  %s878_s0 = inlined_call_operand.hbm [shape: f32[2,4,256], index: 0, kind: input, shape index: {}]   ;;  %s879_s1 = inlined_call_operand.vmem [shape: f32[4,2], index: 1, kind: input, shape index: {}]   ;;  %s880_s2 = inlined_call_operand.vmem [shape: f32[2,4], index: 2, kind: input, shape index: {}]   ;;  %s881_s3 = inlined_call_operand.hbm [shape: f32[2,4,256], index: 3, kind: output, shape index: {}]  }
   0x1   :  { %10 = vsyncpa [#allocation3 + $0x1], 0 }
   0x2   :  { %11 = vsyncpa [#allocation4], 0 }
   0x3   :  { %13 = vsyncpa [#allocation4 + $0x1], 0  ;;  %s702_s12 = smov 0   ;;  %s704_s13 = smov 0  }
   0x4   :  { %s706_s14 = smov 0   ;;  %s708_s15 = smov 0  }
   0x5 LB: > { %s723_s16 = sadd.s32 4294967295, %s675_s15   ;;  %s490_s17 = sadd.s32 4294967294, %s675_s15   ;;  %s675_s15 = sphi %s708_s15, %s896_s15   ;;  %s671_s14 = sphi %s706_s14, %s895_s14   ;;  %s667_s13 = sphi %s704_s13, %s894_s13   ;;  %s663_s12 = sphi %s702_s12, %s893_s12  }
   0x6   : > { %s727_s18 = sadd.s32 1, %s675_s15   ;;  %s26_s19 = sadd.s32 1, %s671_s14 }
   0x7   : > { %s23_s20 = ssub.s32 %s675_s15, %s727_s18  ;;  %p33_p0 = scmp.ne.s32.totalorder %s671_s14, %s667_s13 }
   0x8   : > { %p24_p1 = scmp.eq.s32.totalorder %s23_s20, 0  ;;  %p34_p2 = scmp.eq.s32.totalorder %s675_s15, 0 }
   0x9   : > { %p39_p3 = scmp.ne.s32.totalorder %s667_s13, %s663_s12  ;;  %p40_p4 = scmp.eq.s32.totalorder %s723_s16, 0 }
   0xa   : > { %s739_s21 = scalar_select %p24_p1, %s671_s14, %s26_s19  }
   0xb   : > { %p741_p5 = por %p34_p2, %p33_p0  ;;  %p745_p6 = por %p40_p4, %p39_p3 }
   0xc   : > { %p105_p7 = scmp.eq.s32.totalorder %s723_s16, 1  ;;  %p111_p8 = scmp.eq.s32.totalorder %s490_s17, 1 }
   0xd   : > { %p537_p10 = scmp.lt.s32.totalorder %s675_s15, 2  ;;  %s137_s26 = sand.u32 1, %s671_s14  }
   0xe   : > { %p752_p11 = por %p105_p7, %p33_p0  ;;  %p756_p12 = por %p111_p8, %p39_p3 }
   0xf   : > { %s509_s27 = sshll.u32 %s675_s15, 7  ;;  %s493_s28 = sshll.u32 %s137_s26, 3 }
  0x10   : > { %s885_s24 = scalar_select %p752_p11, 1, 0 }
  0x11   : > { %s886_s25 = scalar_select %p756_p12, 1, 0 }
  0x12   : > { %s765_s4 = scalar_lea.hbm %s878_s0, %s509_s27  ;;  %s141_s5 = scalar_lea.vmem [#allocation2], %s493_s28 }
  0x13   : > { %s149_s6 = sshll.u32 %s141_s5, 4  ;;  %p769_p13 = pnand %p537_p10, %p741_p5  ;;  %s773_s6 = int_to_ptr.vmem [resolvable:$true] %s149_s6 }
  0x14   : > { %s138_s8 = scalar_lea.sflag [#allocation3], %s137_s26  ;;  %s579_s9 = scalar_lea.hbm %s765_s4, 128 }
  0x15   : > { %p580_p2 = scmp.ne.s32.totalorder %s765_s4, %s579_s9  ;;  %p581_p3 = pneg %p769_p13 }
  0x16   : > { %s584_s17 = scalar_lea.hbm %s878_s0, 256  ;;  %p585_p5 = scmp.lt.u32.totalorder %s765_s4, %s878_s0 }
  0x17   : > { %p582_p4 = pnand %p581_p3, %p580_p2  ;;  %p586_p8 = scmp.lt.u32.totalorder %s584_s17, %s579_s9 }
  0x18   : > { %p588_p9 = scmp.lt.u32.totalorder %s579_s9, %s765_s4 }
  0x19   : > { %p583_p7 = pneg %p582_p4  ;;  %p587_p10 = por %p586_p8, %p585_p5 }
  0x1b   : > { %p589_p0 = por %p588_p9, %p587_p10 }
  0x1d   : > { %p590_p1 = pnand %p589_p0, %p583_p7 }
  0x1f   : > { %593 = shalt.err (!%p590_p1)
}
  0x20   : > { %s594_s22 = scalar_lea.vmem %s773_s6, 128  ;;  %s677_s26 = smov [#allocation2]  }
  0x21   : > { %p595_p2 = scmp.ne.s32.totalorder %s773_s6, %s594_s22  ;;  %s599_s27 = sshll.u32 %s677_s26, 4  ;;  %s600_s27 = int_to_ptr.vmem [resolvable:$false] %s599_s27 }
  0x22   : > { %s601_s28 = scalar_lea.vmem %s600_s27, 256  ;;  %p602_p11 = scmp.lt.s32.totalorder %s773_s6, %s600_s27 }
  0x23   : > { %p597_p4 = pnand %p595_p2, %p581_p3  ;;  %p603_p5 = scmp.lt.s32.totalorder %s601_s28, %s594_s22 }
  0x25   : > { %p598_p12 = pneg %p597_p4  ;;  %p604_p8 = por %p603_p5, %p602_p11 }
  0x27   : > { %p605_p9 = pnand %p604_p8, %p598_p12 }
  0x29   : > { %608 = shalt.err (!%p605_p9)
}
  0x2a   : > { %532 = dma.hbm_to_vmem [thread:$0]  (!%p769_p13), %s765_s4, 128, %s773_s6, %s138_s8  }
  0x2b   : > { %p888_p0 = scmp.lt.s32.totalorder %s675_s15, 3  ;;  %p889_p1 = scmp.ge.s32.totalorder %s675_s15, 1 }
  0x2d   : > { %p155_p3 = pnand %p889_p1, %p888_p0 }
  0x2e   : > { %s807_s29 = sand.u32 (!%p155_p3), 1, %s667_s13  }
  0x2f   : > { %158 = sbr.rel (%p155_p3) target bundleno = 801 (0x321), region = 32  ;;  %s497_s30 = sshll.u32 (!%p155_p3), %s807_s29, 3 }
  0x30   : > { %s161_s5 = scalar_lea.sflag (!%p155_p3), [#allocation3], %s807_s29  ;;  %s164_s7 = scalar_lea.vmem (!%p155_p3), [#allocation2], %s497_s30 }
  0x36   : > { %654 = dma.done.wait (%p745_p6), %s161_s5, 128  }
  0x37   : > { %656 = vsyncadd (%p745_p6), %s161_s5, 4294967168  ;;  %vm191_vm0 = vcmask 1043456   ;;  %v187_v0 = vld [vmem:[%s164_s7] sm:$0xff]  ;;  %v678_v9 = vmov 0.0   ;;  %vm679_vm1 = vmmov 0   ;;  %v204_v10 = vlaneseq  ;;  %s510_s9 = sshll.u32 %s723_s16, 7 }
  0x38   : > { %v189_v1 = vcombine.high %v187_v0, %v187_v0  ;;  %v192_v2 = vsel %vm191_vm0, %v187_v0, 0.0  ;;  %v198_v4 = vsel %vm191_vm0, %v187_v0, -inf  ;;  %v219_v8 = vld [vmem:[%s879_s1] sm:$0xf]  ;;  %515 = vmatprep.subr.mxu0 %v678_v9  ;;  %517 = vmatprep.mubr.msk.f32.mxu0 %vm679_vm1, %v678_v9  ;;  %vm217_vm2 = vcmask 1040384   ;;  %s186_s10 = scalar_lea.vmem [#allocation5], %s497_s30  ;;  %s834_s20 = scalar_lea.hbm %s881_s3, %s510_s9 }
  0x39   : > { %516 = vmatpush3.msk.msra.mxu0 %vm191_vm0, %v219_v8  ;;  %520 = vmatprep.subr.mxu1 %v678_v9  ;;  %v205_v11 = vand.u32 127, %v204_v10  ;;  %v207_v12 = vshrl.u32 %v204_v10, 7  ;;  %vm220_vm3 = vcmask 31744   ;;  %v298_v20 = vld [vmem:[%s880_s2] sm:$0x3]  ;;  %vm303_vm4 = vcmask 1041408  }
  0x3a   : > { %v193_v3 = vsel %vm191_vm0, %v189_v1, 0.0  ;;  %v199_v5 = vsel %vm191_vm0, %v189_v1, -inf  ;;  %522 = vmatprep.mubr.msk.f32.mxu1 %vm679_vm1, %v678_v9  ;;  %521 = vmatpush3.msk.msra.mxu1 %vm303_vm4, %v298_v20  ;;  %vm299_vm5 = vcmask 15360   ;;  %v680_v34 = vmov 839922192   ;;  %s420_s11 = sshll.u32 %s186_s10, 4  ;;  %s836_s11 = int_to_ptr.vmem [resolvable:$true] %s420_s11 }
  0x3b   : > { %v194_v6 = vadd.f32 %v193_v3, %v192_v2  ;;  %v200_v7 = vmax.f32 %v198_v4, %v199_v5  ;;  %v208_v14 = vsub.s32 %v205_v11, %v207_v12  ;;  %v389_v31 = vsub.s32 0, %v207_v12  ;;  %s406_s22 = scalar_lea.sflag [#allocation4], %s807_s29  ;;  %s609_s26 = scalar_lea.vmem %s836_s11, 128 }
  0x3c   : > { %v396_v35 = vunpack.c.l.s4 %v680_v34  ;;  %p610_p6 = scmp.ne.s32.totalorder %s836_s11, %s609_s26  ;;  %p890_p11 = scmp.ne.s32.totalorder %s885_s24, 0 }
  0x3d   : > { %195 = vadd.xlane.f32.xlu0 %v194_v6  ;;  %s681_s16 = smov [#allocation5]  }
  0x3e   : > { %v397_v36 = vunpack.c.0.s8 %v396_v35  ;;  %p611_p12 = pnand %p610_p6, %p890_p11  ;;  %s613_s27 = sshll.u32 %s681_s16, 4  ;;  %s614_s27 = int_to_ptr.vmem [resolvable:$false] %s613_s27 }
  0x3f   : > { %s615_s28 = scalar_lea.vmem %s614_s27, 256  ;;  %p616_p7 = scmp.lt.s32.totalorder %s836_s11, %s614_s27 }
  0x40   : > { %v400_v37 = vsub.s32 %v397_v36, %v207_v12  ;;  %p612_p13 = pneg %p611_p12  ;;  %p617_p10 = scmp.lt.s32.totalorder %s615_s28, %s609_s26 }
  0x41   : > { %201 = vmax.xlane.f32.xlu0 %v200_v7 }
  0x42   : > { %p618_p2 = por %p617_p10, %p616_p7 }
  0x44   : > { %p619_p4 = pnand %p618_p2, %p612_p13 }
  0xca   : > { %v196_v13 = vpop.xlane.xlu0 %195 }
  0xcb   : > { %v197_v15 = vmul.f32 0.00390625, %v196_v13 }
  0xcd   : > { %v209_v17 = vrot.slane %v197_v15, %v208_v14 }
  0xce   : > { %v202_v16 = vpop.xlane.xlu0 %201 }
  0xcf   : > { %v215_v18 = vrot.slane %v202_v16, %v208_v14 }
  0xd1   : > { %v218_v19 = vsel %vm217_vm2, %v209_v17, %v215_v18 }
  0xd2   : > { %518 = vmatmul.mubr.msk.f32.vlgmr.msra.gmra.mrb[0].mxu0 %vm220_vm3, %v218_v19 }
 0x1a5   : > { %v293_v21 = vpop.f32.mrb[0].mxu0 }
 0x1a6   : > { %v297_v22 = vmax.f32 %v293_v21, 0.0  ;;  %v519_v23 = vpop.f32.mrb[1].mxu0 }
 0x1a8   : > { %523 = vmatmul.mubr.msk.f32.vlgmr.msra.gmra.mrb[0].mxu1 %vm299_vm5, %v297_v22 }
 0x27b   : > { %v373_v24 = vpop.f32.mrb[0].mxu1 }
 0x27c   : > { %v378_v25 = vrot.slane %v373_v24, 1  ;;  %v524_v26 = vpop.f32.mrb[1].mxu1 }
 0x27e   : > { %v380_v27 = vadd.f32 %v378_v25, %v373_v24 }
 0x280   : > { %v503_v28 = vmul.f32 -1.442695, %v380_v27 }
 0x282   : > { %575 = vpow2.f32 %v503_v28 }
 0x28c   : > { %v576_v29 = vpop.eup %575 }
 0x28d   : > { %v384_v30 = vadd.f32 1.0, %v576_v29 }
 0x28f   : > { %577 = vrcp.f32 %v384_v30 }
 0x299   : > { %v578_v32 = vpop.eup %577 }
 0x29a   : > { %v390_v33 = vrot.slane %v578_v32, %v389_v31 }
 0x29c   : > { %392 = vbcast.lane.b32.xlu1 %v390_v33, 256 }
 0x30e   : > { %v393_v38 = vpop.permute.xlu1 %392 }
 0x30f   : > { %v401_v39 = vrot.slane %v393_v38, %v400_v37 }
 0x311   : > { %v403_v40 = vmul.f32 %v401_v39, %v187_v0 }
 0x313   : > { %404 = vst [vmem:[%s186_s10] sm:$0xff] %v403_v40 }
 0x314   : > { %622 = shalt.err (!%p619_p4)
}
 0x315   : > { %s623_s29 = scalar_lea.hbm %s834_s20, 128  ;;  %s627_s7 = scalar_lea.hbm %s881_s3, 256 }
 0x316   : > { %p624_p5 = scmp.ne.s32.totalorder %s834_s20, %s623_s29  ;;  %p628_p0 = scmp.lt.u32.totalorder %s834_s20, %s881_s3 }
 0x317   : > { %p629_p1 = scmp.lt.u32.totalorder %s627_s7, %s623_s29  ;;  %p631_p6 = scmp.lt.u32.totalorder %s623_s29, %s834_s20 }
 0x318   : > { %p625_p8 = pnand %p624_p5, %p890_p11 }
 0x319   : > { %p630_p3 = por %p629_p1, %p628_p0 }
 0x31a   : > { %p626_p9 = pneg %p625_p8 }
 0x31b   : > { %p632_p12 = por %p631_p6, %p630_p3 }
 0x31d   : > { %p633_p13 = pnand %p632_p12, %p626_p9 }
 0x31f   : > { %636 = shalt.err (!%p633_p13)
}
 0x320   : > { %527 = dma.vmem_to_hbm [thread:$0]  (%p890_p11), %s836_s11, 128, %s834_s20, %s406_s22  }
 0x321 PF: > { %s432_s23 = sand.u32 1, %s663_s12   ;;  %p891_p7 = scmp.ne.s32.totalorder %s886_s25, 0 }
 0x322   : > { %p892_p10 = scmp.ge.s32.totalorder %s675_s15, 2  ;;  %s433_s8 = scalar_lea.sflag [#allocation4], %s432_s23 }
 0x324   : > { %p534_p2 = pnand %p892_p10, %p891_p7 }
 0x326   : > { %658 = dma.done.wait (!%p534_p2), %s433_s8, 128  }
 0x327   : > { %660 = vsyncadd (!%p534_p2), %s433_s8, 4294967168  ;;  %p16_p4 = scmp.ge.s32.totalorder %s727_s18, 4   ;;  %s893_s12 = smov %s667_s13 }
 0x328   : > { %s894_s13 = smov %s671_s14  ;;  %s895_s14 = smov %s739_s21 }
 0x329   : > { %s896_s15 = smov %s727_s18  ;;  %18 = sbr.rel (!%p16_p4) target bundleno = 5 (0x5), region = 77 }
 0x330   :  { %438 = vsyncpa [#allocation3], 1 }
 0x331   :  { %440 = vsyncpa [#allocation3 + $0x1], 1 }
 0x332   :  { %441 = vsyncpa [#allocation4], 1 }
 0x333   :  { %443 = vsyncpa [#allocation4 + $0x1], 1 }

</bundles_post_ra>
